<compile_context>
chip_gen: v7x
topology: tpu7x:2x2x1
jax: 0.10.0
libtpu: 0.0.40
codegen_flags: <defaults>
</compile_context>

<pallas_src>
import jax
import jax.numpy as jnp
from jax.experimental import pallas as pl
from jax.experimental.pallas import tpu as pltpu

# Small shapes consistent with the module's forward pass (batch is 1 by
# construction: the module ends with .view(1, 1, -1)).
HIDDEN = 32          # hidden_size
SEQ = 8              # encoder sequence length
ENC_DIM = 2 * HIDDEN # encoder_output feature dim (attn input is 3*H = H + 2H)


def _attention_kernel(h_ref, enc_ref, w_dec_ref, w_enc_ref, ctx_ref):
    """Fused attention: scores -> softmax over time -> weighted context.

    h_ref:     (1, H)    decoder hidden state
    enc_ref:   (S, 2H)   encoder outputs (time-major rows)
    w_dec_ref: (1, H)    first H columns of attn.weight (multiply decoder hidden)
    w_enc_ref: (1, 2H)   last 2H columns of attn.weight (multiply encoder output)
    ctx_ref:   (1, 2H)   attention-weighted encoder context
    """
    enc = enc_ref[...]                                                  # (S, 2H)

    # Constant (per-call) contribution from the decoder hidden state.
    h_score = jnp.sum(h_ref[...] * w_dec_ref[...], axis=-1,
                      keepdims=True)                                    # (1, 1)

    # Per-timestep scores: fused "expand + concat + Linear" without ever
    # materializing the (S, 3H) input_vector.  Lane reduction on the XLU.
    scores = jnp.sum(enc * w_enc_ref[...], axis=-1,
                     keepdims=True) + h_score                           # (S, 1)

    # Numerically stable softmax over the time (sublane) axis.
    m = jnp.max(scores, axis=0, keepdims=True)                          # (1, 1)
    e = jnp.exp(scores - m)                                             # (S, 1)
    attn = e / jnp.sum(e, axis=0, keepdims=True)                        # (S, 1)

    # context = enc^T @ attn  ==  sum_t attn_t * enc_t ; computed as a
    # broadcasted multiply + sublane reduction (no transpose, one store).
    ctx_ref[...] = jnp.sum(enc * attn, axis=0, keepdims=True)           # (1, 2H)


def attention_forward(attn_weight, decoder_hidden, encoder_output):
    """Mirrors Attention.forward(decoder_hidden, encoder_output).

    attn_weight:    (1, 3H)   nn.Linear(3H, 1).weight
    decoder_hidden: (1, 1, H)
    encoder_output: (1, S, 2H)
    returns input_context: (1, 1, 2H)
    """
    H = decoder_hidden.shape[2]
    S = encoder_output.shape[1]
    E = encoder_output.shape[2]

    h = decoder_hidden.reshape(1, H).astype(jnp.float32)
    enc = encoder_output.reshape(S, E).astype(jnp.float32)
    w_dec = attn_weight[:, :H].astype(jnp.float32)                      # (1, H)
    w_enc = attn_weight[:, H:].astype(jnp.float32)                      # (1, 2H)

    vmem = pl.BlockSpec(memory_space=pltpu.MemorySpace.VMEM)
    ctx = pl.pallas_call(
        _attention_kernel,
        out_shape=jax.ShapeDtypeStruct((1, E), jnp.float32),
        in_specs=[vmem, vmem, vmem, vmem],
        out_specs=vmem,
    )(h, enc, w_dec, w_enc)

    return ctx.reshape(1, 1, E)


def reference_forward(attn_weight, decoder_hidden, encoder_output):
    """Pure-JAX reference matching the PyTorch module line by line."""
    S = encoder_output.shape[1]
    H = decoder_hidden.shape[2]
    dh_expanded = jnp.broadcast_to(decoder_hidden, (1, S, H))
    input_vector = jnp.concatenate([dh_expanded, encoder_output], axis=2)  # (1,S,3H)
    output = jnp.matmul(input_vector, attn_weight.T)                       # (1,S,1)
    attn_weights = jax.nn.softmax(output, axis=1)                          # (1,S,1)
    permuted = jnp.transpose(encoder_output, (0, 2, 1))                    # (1,2H,S)
    input_context = jnp.matmul(permuted, attn_weights).reshape(1, 1, -1)   # (1,1,2H)
    return input_context


if __name__ == "__main__":
    key = jax.random.PRNGKey(0)
    k_w, k_h, k_e = jax.random.split(key, 3)

    attn_weight = 0.1 * jax.random.normal(k_w, (1, 3 * HIDDEN), jnp.float32)
    decoder_hidden = jax.random.normal(k_h, (1, 1, HIDDEN), jnp.float32)
    encoder_output = jax.random.normal(k_e, (1, SEQ, ENC_DIM), jnp.float32)

    ctx = attention_forward(attn_weight, decoder_hidden, encoder_output)
    ctx = jax.block_until_ready(ctx)

    ctx_ref = reference_forward(attn_weight, decoder_hidden, encoder_output)
    assert ctx.shape == (1, 1, ENC_DIM)
    assert jnp.allclose(ctx, ctx_ref, rtol=1e-5, atol=1e-5), (
        f"max abs err = {jnp.max(jnp.abs(ctx - ctx_ref))}")

    print("KERNEL_OK")
</pallas_src>

<mosaic_0001>
module attributes {stable_mosaic.version = 11 : i64} {
  func.func @_attention_kernel(%arg0: memref<1x32xf32, #tpu.memory_space<vmem>>, %arg1: memref<8x64xf32, #tpu.memory_space<vmem>>, %arg2: memref<1x32xf32, #tpu.memory_space<vmem>>, %arg3: memref<1x64xf32, #tpu.memory_space<vmem>>, %arg4: memref<1x64xf32, #tpu.memory_space<vmem>>) attributes {dimension_semantics = [], scalar_prefetch = 0 : i64, scratch_operands = 0 : i64, tpu.core_type = #tpu.core_type<tc>} {
    %c0 = arith.constant 0 : index
    %c0_0 = arith.constant 0 : index
    %0 = vector.load %arg1[%c0, %c0_0] : memref<8x64xf32, #tpu.memory_space<vmem>>, vector<8x64xf32>
    %c0_1 = arith.constant 0 : index
    %c0_2 = arith.constant 0 : index
    %1 = vector.load %arg0[%c0_1, %c0_2] : memref<1x32xf32, #tpu.memory_space<vmem>>, vector<1x32xf32>
    %c0_3 = arith.constant 0 : index
    %c0_4 = arith.constant 0 : index
    %2 = vector.load %arg2[%c0_3, %c0_4] : memref<1x32xf32, #tpu.memory_space<vmem>>, vector<1x32xf32>
    %3 = arith.mulf %1, %2 : vector<1x32xf32>
    %cst = arith.constant dense<0.000000e+00> : vector<1xf32>
    %4 = vector.multi_reduction <add>, %3, %cst [1] : vector<1x32xf32> to vector<1xf32>
    %5 = vector.shape_cast %4 : vector<1xf32> to vector<1x1xf32>
    %c0_5 = arith.constant 0 : index
    %c0_6 = arith.constant 0 : index
    %6 = vector.load %arg3[%c0_5, %c0_6] : memref<1x64xf32, #tpu.memory_space<vmem>>, vector<1x64xf32>
    %7 = vector.broadcast %6 : vector<1x64xf32> to vector<8x64xf32>
    %8 = arith.mulf %0, %7 : vector<8x64xf32>
    %cst_7 = arith.constant dense<0.000000e+00> : vector<8xf32>
    %9 = vector.multi_reduction <add>, %8, %cst_7 [1] : vector<8x64xf32> to vector<8xf32>
    %10 = vector.shape_cast %9 : vector<8xf32> to vector<8x1xf32>
    %11 = vector.broadcast %5 : vector<1x1xf32> to vector<8x1xf32>
    %12 = arith.addf %10, %11 : vector<8x1xf32>
    %cst_8 = arith.constant dense<0xFF800000> : vector<1xf32>
    %13 = vector.multi_reduction <maximumf>, %12, %cst_8 [0] : vector<8x1xf32> to vector<1xf32>
    %14 = vector.shape_cast %13 : vector<1xf32> to vector<1x1xf32>
    %15 = vector.broadcast %14 : vector<1x1xf32> to vector<8x1xf32>
    %16 = arith.subf %12, %15 : vector<8x1xf32>
    %17 = math.exp %16 : vector<8x1xf32>
    %cst_9 = arith.constant dense<0.000000e+00> : vector<1xf32>
    %18 = vector.multi_reduction <add>, %17, %cst_9 [0] : vector<8x1xf32> to vector<1xf32>
    %19 = vector.shape_cast %18 : vector<1xf32> to vector<1x1xf32>
    %20 = vector.broadcast %19 : vector<1x1xf32> to vector<8x1xf32>
    %21 = arith.divf %17, %20 : vector<8x1xf32>
    %22 = vector.broadcast %21 : vector<8x1xf32> to vector<8x64xf32>
    %23 = arith.mulf %0, %22 : vector<8x64xf32>
    %cst_10 = arith.constant dense<0.000000e+00> : vector<64xf32>
    %24 = vector.multi_reduction <add>, %23, %cst_10 [0] : vector<8x64xf32> to vector<64xf32>
    %25 = vector.shape_cast %24 : vector<64xf32> to vector<1x64xf32>
    %c0_11 = arith.constant 0 : index
    %c0_12 = arith.constant 0 : index
    %26 = vector.load %arg4[%c0_11, %c0_12] : memref<1x64xf32, #tpu.memory_space<vmem>>, vector<1x64xf32>
    tpu.vector_store %arg4[%c0_11, %c0_12], %25 {strides = array<i32>} : memref<1x64xf32, #tpu.memory_space<vmem>>, vector<1x64xf32>,
    return
  }
}

</mosaic_0001>

<bundles_post_ra>
// kernel: tpu_custom_call.1
= control target key start
LH: loop header
LB: loop body
LE: loop exit
PB: predicated region body
PF: predicated region fallthrough
CT: control target
= control target key end

     0   :  { %9 = vsyncpa [#allocation3], 0  ;;  %s262_s0 = inlined_call_operand.hbm [shape: f32[1,32], index: 0, kind: input, shape index: {}]   ;;  %s263_s1 = inlined_call_operand.hbm [shape: f32[8,64], index: 1, kind: input, shape index: {}]   ;;  %s264_s2 = inlined_call_operand.vmem [shape: f32[1,32], index: 2, kind: input, shape index: {}]   ;;  %s265_s3 = inlined_call_operand.vmem [shape: f32[1,64], index: 3, kind: input, shape index: {}]   ;;  %s266_s4 = inlined_call_operand.hbm [shape: f32[1,64], index: 4, kind: output, shape index: {}]  }
   0x1   :  { %10 = vsyncpa [#allocation6], 0 }
   0x2   :  { %11 = vsyncpa [#allocation4], 0  ;;  %s190_s15 = smov [#allocation2]   ;;  %s191_s17 = smov [#allocation5]  }
   0x3   :  { %s18_s16 = sshll.u32 %s190_s15, 4  ;;  %s28_s18 = sshll.u32 %s191_s17, 4  ;;  %s19_s16 = int_to_ptr.vmem [resolvable:$true] %s18_s16  ;;  %s29_s18 = int_to_ptr.vmem [resolvable:$true] %s28_s18 }
   0x4   :  { %s118_s21 = scalar_lea.hbm %s262_s0, 16 }
   0x5   :  { %p119_p0 = scmp.ne.s32.totalorder %s262_s0, %s118_s21  ;;  %p122_p1 = scmp.lt.u32.totalorder %s118_s21, %s262_s0 }
   0x7   :  { %p124_p2 = pnand %p122_p1, %p119_p0 }
   0x9   :  { %127 = shalt.err (!%p124_p2)
}
   0xa   :  { %s128_s26 = scalar_lea.vmem %s19_s16, 16  ;;  %s132_s27 = scalar_lea.vmem %s19_s16, 32 }
   0xb   :  { %p129_p3 = scmp.ne.s32.totalorder %s19_s16, %s128_s26  ;;  %p133_p4 = scmp.lt.s32.totalorder %s19_s16, %s19_s16 }
   0xc   :  { %p134_p5 = scmp.lt.s32.totalorder %s132_s27, %s128_s26 }
   0xe   :  { %p135_p6 = por %p134_p5, %p133_p4 }
  0x10   :  { %p136_p7 = pnand %p135_p6, %p129_p3 }
  0x12   :  { %139 = shalt.err (!%p136_p7)
}
  0x13   :  { %21 = dma.hbm_to_vmem [thread:$0]  %s262_s0, 16, %s19_s16, [#allocation3]  }
  0x14   :  { %s140_s6 = scalar_lea.hbm %s263_s1, 128 }
  0x15   :  { %p141_p8 = scmp.ne.s32.totalorder %s263_s1, %s140_s6  ;;  %p144_p9 = scmp.lt.u32.totalorder %s140_s6, %s263_s1 }
  0x17   :  { %p146_p10 = pnand %p144_p9, %p141_p8 }
  0x19   :  { %149 = shalt.err (!%p146_p10)
}
  0x1a   :  { %s150_s11 = scalar_lea.vmem %s29_s18, 128  ;;  %p155_p12 = scmp.lt.s32.totalorder %s29_s18, %s29_s18 }
  0x1b   :  { %p151_p11 = scmp.ne.s32.totalorder %s29_s18, %s150_s11  ;;  %p156_p13 = scmp.lt.s32.totalorder %s150_s11, %s150_s11 }
  0x1d   :  { %p157_p0 = por %p156_p13, %p155_p12 }
  0x1f   :  { %p158_p1 = pnand %p157_p0, %p151_p11 }
  0x21   :  { %161 = shalt.err (!%p158_p1)
}
  0x22   :  { %31 = dma.hbm_to_vmem [thread:$0]  %s263_s1, 128, %s29_s18, [#allocation6]  }
  0x23   :  { %184 = dma.done.wait [#allocation3], 16  }
  0x24   :  { %185 = vsyncadd [#allocation3], 4294967280 }
  0x25   :  { %186 = dma.done.wait [#allocation6], 128  }
  0x26   :  { %187 = vsyncadd [#allocation6], 4294967168  ;;  %v43_v0 = vld [vmem:[#allocation2] sm:$0x1]  ;;  %vm46_vm0 = vcmask 253952   ;;  %v42_v2 = vld [vmem:[#allocation5] sm:$0xff]  ;;  %v62_v8 = vlaneseq }
  0x27   :  { %v44_v1 = vld [vmem:[%s264_s2] sm:$0x1]  ;;  %vm58_vm1 = vcmask 523264   ;;  %s192_s1 = smov [#allocation7]   ;;  %vm92_vm2 = vcmask 516096  }
  0x28   :  { %v45_v3 = vmul.f32 %v44_v1, %v43_v0  ;;  %v110_v4 = vld [vmem:[%s265_s3] ss:$0 sm:$0xff]  ;;  %v63_v9 = vshrl.u32 %v62_v8, 7  ;;  %s100_s2 = sshll.u32 %s192_s1, 4  ;;  %s101_s2 = int_to_ptr.vmem [resolvable:$true] %s100_s2 }
  0x29   :  { %v57_v5 = vmul.f32 %v110_v4, %v42_v2  ;;  %s162_s3 = scalar_lea.vmem %s101_s2, 16  ;;  %s166_s17 = scalar_lea.vmem %s101_s2, 32 }
  0x2a   :  { %v47_v6 = vsel %vm46_vm0, %v45_v3, 0.0  ;;  %v64_v10 = vsub.s32 0, %v63_v9  ;;  %p163_p2 = scmp.ne.s32.totalorder %s101_s2, %s162_s3  ;;  %p167_p3 = scmp.lt.s32.totalorder %s101_s2, %s101_s2 }
  0x2b   :  { %48 = vadd.xlane.f32.xlu0 %v47_v6  ;;  %v59_v7 = vsel %vm58_vm1, %v57_v5, 0.0  ;;  %p168_p4 = scmp.lt.s32.totalorder %s166_s17, %s162_s3 }
  0x2d   :  { %p169_p5 = por %p168_p4, %p167_p3 }
  0x2f   :  { %60 = vadd.xlane.f32.xlu0 %v59_v7  ;;  %p170_p6 = pnand %p169_p5, %p163_p2 }
  0xb8   :  { %v49_v11 = vpop.xlane.xlu0 %48 }
  0xb9   :  { %v65_v12 = vrot.slane %v49_v11, %v64_v10 }
  0xbc   :  { %v61_v13 = vpop.xlane.xlu0 %60 }
  0xbd   :  { %v66_v14 = vadd.f32 %v65_v12, %v61_v13 }
  0xbf   :  { %v67_v15 = vrot.slane %v66_v14, 4 }
  0xc1   :  { %v68_v16 = vmax.f32 %v66_v14, %v67_v15 }
  0xc3   :  { %v69_v17 = vrot.slane %v68_v16, 2 }
  0xc5   :  { %v70_v18 = vmax.f32 %v68_v16, %v69_v17 }
  0xc7   :  { %v71_v19 = vrot.slane %v70_v18, 1 }
  0xc9   :  { %v72_v20 = vmax.f32 %v70_v18, %v71_v19 }
  0xcb   :  { %v73_v21 = vsub.f32 %v66_v14, %v72_v20 }
  0xcd   :  { %v74_v22 = vmul.f32 1.442695, %v73_v21 }
  0xcf   :  { %114 = vpow2.f32 %v74_v22 }
  0xd9   :  { %v115_v23 = vpop.eup %114 }
  0xda   :  { %v76_v24 = vrot.slane %v115_v23, 4 }
  0xdc   :  { %v77_v25 = vadd.f32 %v115_v23, %v76_v24 }
  0xde   :  { %v78_v26 = vrot.slane %v77_v25, 2 }
  0xe0   :  { %v79_v27 = vadd.f32 %v78_v26, %v77_v25 }
  0xe2   :  { %v80_v28 = vrot.slane %v79_v27, 1 }
  0xe4   :  { %v81_v29 = vadd.f32 %v80_v28, %v79_v27 }
  0xe6   :  { %116 = vrcp.f32 %v81_v29 }
  0xf0   :  { %v117_v30 = vpop.eup %116 }
  0xf1   :  { %v83_v31 = vmul.f32 %v117_v30, %v115_v23 }
  0xf3   :  { %v84_v32 = vmul.f32 %v83_v31, %v42_v2 }
  0xf5   :  { %v85_v33 = vsel %vm58_vm1, %v84_v32, 0.0 }
  0xf6   :  { %v86_v34 = vrot.slane %v85_v33, 4 }
  0xf8   :  { %v87_v35 = vadd.f32 %v86_v34, %v85_v33 }
  0xfa   :  { %v88_v36 = vrot.slane %v87_v35, 2 }
  0xfc   :  { %v89_v37 = vadd.f32 %v88_v36, %v87_v35 }
  0xfe   :  { %v90_v38 = vrot.slane %v89_v37, 1 }
 0x100   :  { %v91_v39 = vadd.f32 %v90_v38, %v89_v37 }
 0x102   :  { %93 = vst.msk [vmem:[#allocation7] sm:$0x1] %vm92_vm2, %v91_v39 }
 0x103   :  { %173 = shalt.err (!%p170_p6)
}
 0x104   :  { %s174_s20 = scalar_lea.hbm %s266_s4, 16 }
 0x105   :  { %p175_p7 = scmp.ne.s32.totalorder %s266_s4, %s174_s20  ;;  %p178_p8 = scmp.lt.u32.totalorder %s174_s20, %s266_s4 }
 0x107   :  { %p180_p9 = pnand %p178_p8, %p175_p7 }
 0x109   :  { %183 = shalt.err (!%p180_p9)
}
 0x10a   :  { %103 = dma.vmem_to_hbm [thread:$0]  %s101_s2, 16, %s266_s4, [#allocation4]  }
 0x10b   :  { %188 = dma.done.wait [#allocation4], 16  }
 0x10c   :  { %189 = vsyncadd [#allocation4], 4294967280 }
 0x10d   :  { %107 = vsyncpa [#allocation3], 1 }
 0x10e   :  { %108 = vsyncpa [#allocation6], 1 }
 0x10f   :  { %109 = vsyncpa [#allocation4], 1 }

</bundles_post_ra>
